<compile_context>
chip_gen: v6e
topology: v6e:2x2x1
jax: 0.10.0
libtpu: 0.0.40
codegen_flags: <defaults>
</compile_context>

<pallas_src>
import jax
import jax.numpy as jnp
from jax.experimental import pallas as pl
from jax.experimental.pallas import tpu as pltpu


def _round_up(x, m):
    return ((x + m - 1) // m) * m


# ---------------------------------------------------------------------------
# Pallas kernel: fused circular im2col + single MXU matmul, one image / step.
# ---------------------------------------------------------------------------
def _make_subpixel_conv_kernel(Cin, Wp, P, K_pad, taps):
    n_taps = len(taps)

    def kernel(x_ref, w_ref, o_ref, patches_ref):
        # x_ref:       (1, Cin, P)        f32   W-padded, row-major flattened image
        # w_ref:       (Cout_pad, K_pad)  bf16  zero-padded flattened conv weights
        # o_ref:       (1, Cout_pad, P)   bf16
        # patches_ref: (K_pad, P)         bf16  VMEM scratch (im2col matrix)
        xb = x_ref[0].astype(jnp.bfloat16)                       # (Cin, P)

        # Zero the K padding rows so no garbage (NaN) ever reaches the MXU.
        if K_pad > n_taps * Cin:
            patches_ref[n_taps * Cin:, :] = jnp.zeros(
                (K_pad - n_taps * Cin, P), jnp.bfloat16)

        # Fused circular im2col.  Tap (dh, dw) of the 3x3 kernel is a cyclic
        # shift of the flat (H, W+2)-row-major pixel axis by s = dh*Wp + dw:
        # the W wrap is already baked into the 2-column pad, and the H wrap is
        # exact under the flat cyclic shift.  The shift is written explicitly
        # as two contiguous lane slices into the scratch (no roll/concat).
        for t, (dh, dw) in enumerate(taps):
            k = (dh * Wp + dw) % P
            r0 = t * Cin
            if k == 0:
                patches_ref[r0:r0 + Cin, :] = xb
            else:
                patches_ref[r0:r0 + Cin, 0:P - k] = xb[:, k:P]
                patches_ref[r0:r0 + Cin, P - k:P] = xb[:, 0:k]

        # One MXU contraction: (Cout_pad, K_pad) @ (K_pad, P), f32 accumulate,
        # bf16 store (halves the dominant HBM stream).
        acc = jnp.dot(w_ref[...], patches_ref[...],
                      preferred_element_type=jnp.float32)
        o_ref[0] = acc.astype(o_ref.dtype)

    return kernel


# ---------------------------------------------------------------------------
# Full SubPixelConv2D forward (Pallas conv + XLA layout glue).
# ---------------------------------------------------------------------------
def subpixel_conv2d_forward(x, weight, img_shape, patch_size):
    """
    x:      (B, in_channels, H, W)                    -- torch NCHW
    weight: (out_channels*ps^2, in_channels, 3, 3)    -- torch OIHW
    """
    B, Cin, H, W = x.shape
    Cout = weight.shape[0]
    r = patch_size
    out_ch = Cout // (r * r)

    taps = tuple((dh, dw) for dh in (-1, 0, 1) for dw in (-1, 0, 1))
    n_taps = len(taps)
    Wp = W + 2                      # width after 1-pixel circular pad in W
    P = H * Wp                      # flat pixel axis per image (lane dim)
    K = n_taps * Cin
    K_pad = _round_up(K, 128)       # contraction depth padded for the MXU
    Cout_pad = _round_up(Cout, 8)   # sublane-aligned M dim

    # --- tiny XLA prep on the *unexpanded* tensors ---------------------------
    # Circular pad in W only (H wrap handled exactly inside the kernel).
    x_wp = jnp.concatenate([x[..., -1:], x, x[..., :1]], axis=-1)  # (B,Cin,H,Wp)
    x_flat = x_wp.reshape(B, Cin, P)                               # free reshape

    # OIHW -> (Cout, kh, kw, Cin) -> (Cout, 9*Cin); zero-pad to (Cout_pad, K_pad).
    w_flat = jnp.transpose(weight, (0, 2, 3, 1)).reshape(Cout, K)
    w_flat = jnp.pad(w_flat, ((0, Cout_pad - Cout), (0, K_pad - K)))
    w_flat = w_flat.astype(jnp.bfloat16)

    kernel = _make_subpixel_conv_kernel(Cin, Wp, P, K_pad, taps)

    y = pl.pallas_call(
        kernel,
        out_shape=jax.ShapeDtypeStruct((B, Cout_pad, P), jnp.bfloat16),
        grid=(B,),
        in_specs=[
            pl.BlockSpec((1, Cin, P), lambda b: (b, 0, 0)),
            pl.BlockSpec((Cout_pad, K_pad), lambda b: (0, 0)),
        ],
        out_specs=pl.BlockSpec((1, Cout_pad, P), lambda b: (b, 0, 0)),
        scratch_shapes=[pltpu.VMEM((K_pad, P), jnp.bfloat16)],
        compiler_params=pltpu.CompilerParams(
            dimension_semantics=("parallel",),
            vmem_limit_bytes=32 * 1024 * 1024,
        ),
        cost_estimate=pl.CostEstimate(
            flops=int(2 * B * Cout_pad * K_pad * P),
            transcendentals=0,
            bytes_accessed=int(x_flat.size * x_flat.dtype.itemsize
                               + w_flat.size * w_flat.dtype.itemsize
                               + B * Cout_pad * P * 2),
        ),
    )(x_flat, w_flat)                                   # (B, Cout_pad, P) bf16

    # --- pixel shuffle + center crop (zero-FLOP layout glue) -----------------
    # TODO(synk): fold this permutation into the kernel's out_specs to remove
    # the remaining post-matmul HBM round trip.
    y = y[:, :Cout, :].reshape(B, out_ch, r, r, H, Wp)[..., 1:W + 1]
    y = jnp.transpose(y, (0, 1, 4, 2, 5, 3)).reshape(B, out_ch, H * r, W * r)

    Ho, Wo = H * r, W * r
    h_pad = Ho - img_shape[0]
    w_pad = Wo - img_shape[1]
    top = h_pad // 2
    bottom = h_pad - top
    left = w_pad // 2
    right = w_pad - left
    return y[:, :, top:Ho - bottom, left:Wo - right].astype(x.dtype)


# ---------------------------------------------------------------------------
# References.
# ---------------------------------------------------------------------------
def subpixel_conv2d_matched_ref(x, weight, img_shape, patch_size):
    """Pure-JAX reference with the same bf16 operands / f32 acc / bf16 store."""
    B, Cin, H, W = x.shape
    Cout = weight.shape[0]
    r = patch_size
    out_ch = Cout // (r * r)
    xh = jnp.transpose(x, (0, 2, 3, 1)).astype(jnp.bfloat16)       # (B,H,W,Cin)
    taps = [jnp.roll(xh, shift=(-dh, -dw), axis=(1, 2))
            for dh in (-1, 0, 1) for dw in (-1, 0, 1)]
    patches = jnp.concatenate(taps, axis=-1).reshape(B * H * W, 9 * Cin)
    w_flat = jnp.transpose(weight, (2, 3, 1, 0)).reshape(9 * Cin, Cout)
    y = jnp.dot(patches, w_flat.astype(jnp.bfloat16),
                preferred_element_type=jnp.float32).astype(jnp.bfloat16)
    y = y.reshape(B, H, W, out_ch, r, r)
    y = jnp.transpose(y, (0, 3, 1, 4, 2, 5)).reshape(B, out_ch, H * r, W * r)
    Ho, Wo = H * r, W * r
    h_pad = Ho - img_shape[0]
    w_pad = Wo - img_shape[1]
    top = h_pad // 2
    bottom = h_pad - top
    left = w_pad // 2
    right = w_pad - left
    return y[:, :, top:Ho - bottom, left:Wo - right].astype(x.dtype)


def subpixel_conv2d_reference_f32(x, weight, img_shape, patch_size):
    """Fully-f32 reference: lax.conv with circular pad + pixel shuffle + crop."""
    B, Cin, H, W = x.shape
    r = patch_size
    out_ch = weight.shape[0] // (r * r)
    xh = jnp.transpose(x, (0, 2, 3, 1))
    xp = jnp.pad(xh, ((0, 0), (1, 1), (1, 1), (0, 0)), mode="wrap")
    w_hwio = jnp.transpose(weight, (2, 3, 1, 0))
    y = jax.lax.conv_general_dilated(
        xp, w_hwio, window_strides=(1, 1), padding="VALID",
        dimension_numbers=("NHWC", "HWIO", "NHWC"),
        precision=jax.lax.Precision.HIGHEST)
    y = y.reshape(B, H, W, out_ch, r, r)
    y = jnp.transpose(y, (0, 3, 1, 4, 2, 5)).reshape(B, out_ch, H * r, W * r)
    Ho, Wo = H * r, W * r
    h_pad = Ho - img_shape[0]
    w_pad = Wo - img_shape[1]
    top = h_pad // 2
    bottom = h_pad - top
    left = w_pad // 2
    right = w_pad - left
    return y[:, :, top:Ho - bottom, left:Wo - right]


# ---------------------------------------------------------------------------
# Driver
# ---------------------------------------------------------------------------
if __name__ == "__main__":
    key = jax.random.PRNGKey(0)
    kx, kw = jax.random.split(key)

    # Module config (small, consistent with SubPixelConv2D.__init__).
    B, in_channels, H, W = 2, 8, 16, 16
    patch_size = 2
    out_channels = 32                    # Cout = out_channels*ps^2 = 128
    img_shape = (30, 30)                 # (Lat, Lon) < (H*ps, W*ps) -> exercises crop

    x = jax.random.normal(kx, (B, in_channels, H, W), jnp.float32)

    # ICNR init: kaiming-normal sub-kernel repeat_interleaved ps^2 times.
    fan_in = in_channels * 3 * 3
    sub_kernel = jax.random.normal(
        kw, (out_channels, in_channels, 3, 3), jnp.float32) * jnp.sqrt(2.0 / fan_in)
    weight = jnp.repeat(sub_kernel, patch_size ** 2, axis=0)  # (out_ch*ps^2, Cin, 3, 3)

    out = jax.block_until_ready(
        subpixel_conv2d_forward(x, weight, img_shape, patch_size))

    ref_bf16 = jax.block_until_ready(
        subpixel_conv2d_matched_ref(x, weight, img_shape, patch_size))
    ref_f32 = jax.block_until_ready(
        subpixel_conv2d_reference_f32(x, weight, img_shape, patch_size))

    expected_shape = (B, out_channels, img_shape[0], img_shape[1])
    assert out.shape == expected_shape, (out.shape, expected_shape)
    # Matched-precision check (same bf16 rounding points): tight up to 1 bf16 ulp.
    assert jnp.allclose(out, ref_bf16, atol=4e-2, rtol=1e-2), \
        float(jnp.max(jnp.abs(out - ref_bf16)))
    # Full-f32 check: loose tolerance for the intentional bf16 operand/output cast.
    assert jnp.allclose(out, ref_f32, atol=6e-2, rtol=5e-2), \
        float(jnp.max(jnp.abs(out - ref_f32)))

    print("KERNEL_OK")
</pallas_src>

<mosaic_0001>
module attributes {stable_mosaic.version = 11 : i64} {
  func.func @kernel(%arg0: i32, %arg1: memref<1x8x288xf32, #tpu.memory_space<vmem>>, %arg2: memref<128x128xbf16, #tpu.memory_space<vmem>>, %arg3: memref<1x128x288xbf16, #tpu.memory_space<vmem>>, %arg4: memref<128x288xbf16, #tpu.memory_space<vmem>>) attributes {dimension_semantics = [#tpu.dimension_semantics<parallel>], iteration_bounds = array<i64: 2>, scalar_prefetch = 0 : i64, scratch_operands = 1 : i64, tpu.core_type = #tpu.core_type<tc>, window_params = [{transform_indices = @transform_0, window_bounds = array<i64: 1, 8, 288>}, {pipeline_mode = #tpu.pipeline_mode<synchronous>, transform_indices = @transform_1, window_bounds = array<i64: 128, 128>}, {transform_indices = @transform_2, window_bounds = array<i64: 1, 128, 288>}]} {
    %c0 = arith.constant 0 : index
    %c0_0 = arith.constant 0 : index
    %c0_1 = arith.constant 0 : index
    %0 = vector.load %arg1[%c0, %c0_0, %c0_1] : memref<1x8x288xf32, #tpu.memory_space<vmem>>, vector<1x8x288xf32>
    %1 = vector.shape_cast %0 : vector<1x8x288xf32> to vector<8x288xf32>
    %2 = arith.truncf %1 : vector<8x288xf32> to vector<8x288xbf16>
    %cst = arith.constant 0.000000e+00 : bf16
    %3 = vector.broadcast %cst : bf16 to vector<56x288xbf16>
    %c72 = arith.constant 72 : index
    %c0_2 = arith.constant 0 : index
    %4 = vector.load %arg4[%c72, %c0_2] : memref<128x288xbf16, #tpu.memory_space<vmem>>, vector<56x288xbf16>
    tpu.vector_store %arg4[%c72, %c0_2], %3 {strides = array<i32>} : memref<128x288xbf16, #tpu.memory_space<vmem>>, vector<56x288xbf16>,
    %5 = vector.extract_strided_slice %2 {offsets = [0, 269], sizes = [8, 19], strides = [1, 1]} : vector<8x288xbf16> to vector<8x19xbf16>
    %c0_3 = arith.constant 0 : index
    %c0_4 = arith.constant 0 : index
    %6 = vector.load %arg4[%c0_3, %c0_4] : memref<128x288xbf16, #tpu.memory_space<vmem>>, vector<8x19xbf16>
    tpu.vector_store %arg4[%c0_3, %c0_4], %5 {strides = array<i32>} : memref<128x288xbf16, #tpu.memory_space<vmem>>, vector<8x19xbf16>,
    %7 = vector.extract_strided_slice %2 {offsets = [0, 0], sizes = [8, 269], strides = [1, 1]} : vector<8x288xbf16> to vector<8x269xbf16>
    %c0_5 = arith.constant 0 : index
    %c19 = arith.constant 19 : index
    %8 = vector.load %arg4[%c0_5, %c19] : memref<128x288xbf16, #tpu.memory_space<vmem>>, vector<8x269xbf16>
    tpu.vector_store %arg4[%c0_5, %c19], %7 {strides = array<i32>} : memref<128x288xbf16, #tpu.memory_space<vmem>>, vector<8x269xbf16>,
    %9 = vector.extract_strided_slice %2 {offsets = [0, 270], sizes = [8, 18], strides = [1, 1]} : vector<8x288xbf16> to vector<8x18xbf16>
    %c8 = arith.constant 8 : index
    %c0_6 = arith.constant 0 : index
    %10 = vector.load %arg4[%c8, %c0_6] : memref<128x288xbf16, #tpu.memory_space<vmem>>, vector<8x18xbf16>
    tpu.vector_store %arg4[%c8, %c0_6], %9 {strides = array<i32>} : memref<128x288xbf16, #tpu.memory_space<vmem>>, vector<8x18xbf16>,
    %11 = vector.extract_strided_slice %2 {offsets = [0, 0], sizes = [8, 270], strides = [1, 1]} : vector<8x288xbf16> to vector<8x270xbf16>
    %c8_7 = arith.constant 8 : index
    %c18 = arith.constant 18 : index
    %12 = vector.load %arg4[%c8_7, %c18] : memref<128x288xbf16, #tpu.memory_space<vmem>>, vector<8x270xbf16>
    tpu.vector_store %arg4[%c8_7, %c18], %11 {strides = array<i32>} : memref<128x288xbf16, #tpu.memory_space<vmem>>, vector<8x270xbf16>,
    %13 = vector.extract_strided_slice %2 {offsets = [0, 271], sizes = [8, 17], strides = [1, 1]} : vector<8x288xbf16> to vector<8x17xbf16>
    %c16 = arith.constant 16 : index
    %c0_8 = arith.constant 0 : index
    %14 = vector.load %arg4[%c16, %c0_8] : memref<128x288xbf16, #tpu.memory_space<vmem>>, vector<8x17xbf16>
    tpu.vector_store %arg4[%c16, %c0_8], %13 {strides = array<i32>} : memref<128x288xbf16, #tpu.memory_space<vmem>>, vector<8x17xbf16>,
    %15 = vector.extract_strided_slice %2 {offsets = [0, 0], sizes = [8, 271], strides = [1, 1]} : vector<8x288xbf16> to vector<8x271xbf16>
    %c16_9 = arith.constant 16 : index
    %c17 = arith.constant 17 : index
    %16 = vector.load %arg4[%c16_9, %c17] : memref<128x288xbf16, #tpu.memory_space<vmem>>, vector<8x271xbf16>
    tpu.vector_store %arg4[%c16_9, %c17], %15 {strides = array<i32>} : memref<128x288xbf16, #tpu.memory_space<vmem>>, vector<8x271xbf16>,
    %17 = vector.extract_strided_slice %2 {offsets = [0, 287], sizes = [8, 1], strides = [1, 1]} : vector<8x288xbf16> to vector<8x1xbf16>
    %c24 = arith.constant 24 : index
    %c0_10 = arith.constant 0 : index
    %18 = vector.load %arg4[%c24, %c0_10] : memref<128x288xbf16, #tpu.memory_space<vmem>>, vector<8x1xbf16>
    tpu.vector_store %arg4[%c24, %c0_10], %17 {strides = array<i32>} : memref<128x288xbf16, #tpu.memory_space<vmem>>, vector<8x1xbf16>,
    %19 = vector.extract_strided_slice %2 {offsets = [0, 0], sizes = [8, 287], strides = [1, 1]} : vector<8x288xbf16> to vector<8x287xbf16>
    %c24_11 = arith.constant 24 : index
    %c1 = arith.constant 1 : index
    %20 = vector.load %arg4[%c24_11, %c1] : memref<128x288xbf16, #tpu.memory_space<vmem>>, vector<8x287xbf16>
    tpu.vector_store %arg4[%c24_11, %c1], %19 {strides = array<i32>} : memref<128x288xbf16, #tpu.memory_space<vmem>>, vector<8x287xbf16>,
    %c32 = arith.constant 32 : index
    %c0_12 = arith.constant 0 : index
    %21 = vector.load %arg4[%c32, %c0_12] : memref<128x288xbf16, #tpu.memory_space<vmem>>, vector<8x288xbf16>
    tpu.vector_store %arg4[%c32, %c0_12], %2 {strides = array<i32>} : memref<128x288xbf16, #tpu.memory_space<vmem>>, vector<8x288xbf16>,
    %22 = vector.extract_strided_slice %2 {offsets = [0, 1], sizes = [8, 287], strides = [1, 1]} : vector<8x288xbf16> to vector<8x287xbf16>
    %c40 = arith.constant 40 : index
    %c0_13 = arith.constant 0 : index
    %23 = vector.load %arg4[%c40, %c0_13] : memref<128x288xbf16, #tpu.memory_space<vmem>>, vector<8x287xbf16>
    tpu.vector_store %arg4[%c40, %c0_13], %22 {strides = array<i32>} : memref<128x288xbf16, #tpu.memory_space<vmem>>, vector<8x287xbf16>,
    %24 = vector.extract_strided_slice %2 {offsets = [0, 0], sizes = [8, 1], strides = [1, 1]} : vector<8x288xbf16> to vector<8x1xbf16>
    %c40_14 = arith.constant 40 : index
    %c287 = arith.constant 287 : index
    %25 = vector.load %arg4[%c40_14, %c287] : memref<128x288xbf16, #tpu.memory_space<vmem>>, vector<8x1xbf16>
    tpu.vector_store %arg4[%c40_14, %c287], %24 {strides = array<i32>} : memref<128x288xbf16, #tpu.memory_space<vmem>>, vector<8x1xbf16>,
    %26 = vector.extract_strided_slice %2 {offsets = [0, 17], sizes = [8, 271], strides = [1, 1]} : vector<8x288xbf16> to vector<8x271xbf16>
    %c48 = arith.constant 48 : index
    %c0_15 = arith.constant 0 : index
    %27 = vector.load %arg4[%c48, %c0_15] : memref<128x288xbf16, #tpu.memory_space<vmem>>, vector<8x271xbf16>
    tpu.vector_store %arg4[%c48, %c0_15], %26 {strides = array<i32>} : memref<128x288xbf16, #tpu.memory_space<vmem>>, vector<8x271xbf16>,
    %28 = vector.extract_strided_slice %2 {offsets = [0, 0], sizes = [8, 17], strides = [1, 1]} : vector<8x288xbf16> to vector<8x17xbf16>
    %c48_16 = arith.constant 48 : index
    %c271 = arith.constant 271 : index
    %29 = vector.load %arg4[%c48_16, %c271] : memref<128x288xbf16, #tpu.memory_space<vmem>>, vector<8x17xbf16>
    tpu.vector_store %arg4[%c48_16, %c271], %28 {strides = array<i32>} : memref<128x288xbf16, #tpu.memory_space<vmem>>, vector<8x17xbf16>,
    %30 = vector.extract_strided_slice %2 {offsets = [0, 18], sizes = [8, 270], strides = [1, 1]} : vector<8x288xbf16> to vector<8x270xbf16>
    %c56 = arith.constant 56 : index
    %c0_17 = arith.constant 0 : index
    %31 = vector.load %arg4[%c56, %c0_17] : memref<128x288xbf16, #tpu.memory_space<vmem>>, vector<8x270xbf16>
    tpu.vector_store %arg4[%c56, %c0_17], %30 {strides = array<i32>} : memref<128x288xbf16, #tpu.memory_space<vmem>>, vector<8x270xbf16>,
    %32 = vector.extract_strided_slice %2 {offsets = [0, 0], sizes = [8, 18], strides = [1, 1]} : vector<8x288xbf16> to vector<8x18xbf16>
    %c56_18 = arith.constant 56 : index
    %c270 = arith.constant 270 : index
    %33 = vector.load %arg4[%c56_18, %c270] : memref<128x288xbf16, #tpu.memory_space<vmem>>, vector<8x18xbf16>
    tpu.vector_store %arg4[%c56_18, %c270], %32 {strides = array<i32>} : memref<128x288xbf16, #tpu.memory_space<vmem>>, vector<8x18xbf16>,
    %34 = vector.extract_strided_slice %2 {offsets = [0, 19], sizes = [8, 269], strides = [1, 1]} : vector<8x288xbf16> to vector<8x269xbf16>
    %c64 = arith.constant 64 : index
    %c0_19 = arith.constant 0 : index
    %35 = vector.load %arg4[%c64, %c0_19] : memref<128x288xbf16, #tpu.memory_space<vmem>>, vector<8x269xbf16>
    tpu.vector_store %arg4[%c64, %c0_19], %34 {strides = array<i32>} : memref<128x288xbf16, #tpu.memory_space<vmem>>, vector<8x269xbf16>,
    %36 = vector.extract_strided_slice %2 {offsets = [0, 0], sizes = [8, 19], strides = [1, 1]} : vector<8x288xbf16> to vector<8x19xbf16>
    %c64_20 = arith.constant 64 : index
    %c269 = arith.constant 269 : index
    %37 = vector.load %arg4[%c64_20, %c269] : memref<128x288xbf16, #tpu.memory_space<vmem>>, vector<8x19xbf16>
    tpu.vector_store %arg4[%c64_20, %c269], %36 {strides = array<i32>} : memref<128x288xbf16, #tpu.memory_space<vmem>>, vector<8x19xbf16>,
    %c0_21 = arith.constant 0 : index
    %c0_22 = arith.constant 0 : index
    %38 = vector.load %arg2[%c0_21, %c0_22] : memref<128x128xbf16, #tpu.memory_space<vmem>>, vector<128x128xbf16>
    %c0_23 = arith.constant 0 : index
    %c0_24 = arith.constant 0 : index
    %39 = vector.load %arg4[%c0_23, %c0_24] : memref<128x288xbf16, #tpu.memory_space<vmem>>, vector<128x288xbf16>
    %cst_25 = arith.constant dense<0.000000e+00> : vector<128x288xf32>
    %40 = tpu.matmul %38, %39, %cst_25 {dimension_numbers = #tpu.dot_dimension_numbers<[1], [0], [0], [1], [0, 0, 1, 1], [], []>} : vector<128x128xbf16>, vector<128x288xbf16>, vector<128x288xf32> -> vector<128x288xf32>
    %41 = arith.truncf %40 : vector<128x288xf32> to vector<128x288xbf16>
    %c0_26 = arith.constant 0 : index
    %c0_27 = arith.constant 0 : index
    %c0_28 = arith.constant 0 : index
    %42 = vector.load %arg3[%c0_26, %c0_27, %c0_28] : memref<1x128x288xbf16, #tpu.memory_space<vmem>>, vector<1x128x288xbf16>
    %43 = vector.shape_cast %42 : vector<1x128x288xbf16> to vector<128x288xbf16>
    %44 = vector.shape_cast %41 : vector<128x288xbf16> to vector<1x128x288xbf16>
    tpu.vector_store %arg3[%c0_26, %c0_27, %c0_28], %44 {strides = array<i32>} : memref<1x128x288xbf16, #tpu.memory_space<vmem>>, vector<1x128x288xbf16>,
    return
  }
  func.func @transform_0(%arg0: i32) -> (i32, i32, i32) {
    %c0_i32 = arith.constant 0 : i32
    %c0_i32_0 = arith.constant 0 : i32
    %c0_i32_1 = arith.constant 0 : i32
    return %arg0, %c0_i32, %c0_i32_0 : i32, i32, i32
  }
  func.func @transform_1(%arg0: i32) -> (i32, i32) {
    %c0_i32 = arith.constant 0 : i32
    %c0_i32_0 = arith.constant 0 : i32
    %c0_i32_1 = arith.constant 0 : i32
    return %c0_i32, %c0_i32_0 : i32, i32
  }
  func.func @transform_2(%arg0: i32) -> (i32, i32, i32) {
    %c0_i32 = arith.constant 0 : i32
    %c0_i32_0 = arith.constant 0 : i32
    %c0_i32_1 = arith.constant 0 : i32
    return %arg0, %c0_i32, %c0_i32_0 : i32, i32, i32
  }
}

</mosaic_0001>

<bundles_post_ra>
// kernel: tpu_custom_call.1
= control target key start
LH: loop header
LB: loop body
LE: loop exit
PB: predicated region body
PF: predicated region fallthrough
CT: control target
= control target key end

     0   :  { %7 = vsyncpa [#allocation4], 0  ;;  %s1706_s0 = inlined_call_operand.hbm [shape: f32[2,8,288], index: 0, kind: input, shape index: {}]   ;;  %s1707_s1 = inlined_call_operand.hbm [shape: bf16[128,128], index: 1, kind: input, shape index: {}]   ;;  %s1708_s2 = inlined_call_operand.vmem [shape: bf16[2,128,288], index: 2, kind: output, shape index: {}]  }
   0x1   :  { %9 = vsyncpa [#allocation4 + $0x1], 0 }
   0x2   :  { %10 = vsyncpa [#allocation6], 0  ;;  %s1454_s9 = smov 0   ;;  %s1456_s10 = smov 0  }
   0x3   :  { %s1458_s11 = smov 0   ;;  %s1460_s12 = smov 0  }
   0x4 LB: > { %s1473_s13 = sadd.s32 4294967295, %s1416_s12   ;;  %p36_p0 = scmp.ne.s32.totalorder %s1408_s10, %s1404_s9  ;;  %s1416_s12 = sphi %s1460_s12, %s1723_s12   ;;  %s1412_s11 = sphi %s1458_s11, %s1722_s11   ;;  %s1408_s10 = sphi %s1456_s10, %s1721_s10   ;;  %s1404_s9 = sphi %s1454_s9, %s1720_s9  }
   0x5   : > { %p1709_p1 = scmp.eq.s32.totalorder %s1473_s13, 0  ;;  %p1070_p2 = scmp.ge.s32.totalorder %s1416_s12, 1 }
   0x6   : > { %p94_p3 = scmp.lt.s32.totalorder %s1416_s12, 3  ;;  %s1418_s16 = smov [#allocation5]  }
   0x7   : > { %p1481_p4 = por %p1709_p1, %p36_p0  ;;  %s106_s17 = sshll.u32 %s1418_s16, 4  ;;  %s107_s17 = int_to_ptr.vmem [resolvable:$true] %s106_s17 }
   0x8   : > { %p1485_p5 = pnand %p1070_p2, %p94_p3  ;;  %s1498_s19 = sadd.s32 1, %s1416_s12  }
   0x9   : > { %s1712_s14 = scalar_select %p1481_p4, 1, 0 }
   0xa   : > { %s1713_s15 = scalar_select %p1485_p5, 1, 0 }
   0xb   : > { %p1239_p6 = pneg %p1485_p5  ;;  %s23_s20 = sadd.s32 1, %s1412_s11 }
   0xc   : > { %s20_s21 = ssub.s32 %s1416_s12, %s1498_s19  ;;  %s1335_s22 = scalar_lea.vmem %s107_s17, 1024 }
   0xd   : > { %p1493_p7 = pnand %p1239_p6, %p1709_p1  ;;  %p1336_p9 = scmp.ne.s32.totalorder %s107_s17, %s1335_s22 }
   0xe   : > { %p1343_p12 = scmp.lt.s32.totalorder %s107_s17, %s107_s17  ;;  %p1344_p13 = scmp.lt.s32.totalorder %s1335_s22, %s1335_s22 }
   0xf   : > { %p1326_p8 = pneg %p1493_p7 }
  0x10   : > { %p1345_p0 = por %p1344_p13, %p1343_p12 }
  0x11   : > { %p1338_p10 = pnand %p1336_p9, %p1326_p8 }
  0x13   : > { %p1339_p11 = pneg %p1338_p10 }
  0x15   : > { %p1346_p2 = pnand %p1345_p0, %p1339_p11 }
  0x17   : > { %1349 = shalt.err (!%p1346_p2)
}
  0x18   : > { %s1419_s23 = smov 64   ;;  %s1420_s24 = smov 4  }
  0x19   : > { %1242 = dma.hbm_to_vmem [thread:$0]  (!%p1493_p7), %s1707_s1, 1024, %s107_s17, [#allocation6], %s1419_s23, %s1419_s23, %s1420_s24  }
  0x1a   : > { %p21_p3 = scmp.eq.s32.totalorder %s20_s21, 0  ;;  %p30_p6 = scmp.ne.s32.totalorder %s1412_s11, %s1408_s10 }
  0x1b   : > { %p31_p8 = scmp.eq.s32.totalorder %s1416_s12, 0  ;;  %p1248_p9 = scmp.lt.s32.totalorder %s1416_s12, 2 }
  0x1c   : > { %s1515_s27 = scalar_select %p21_p3, %s1412_s11, %s23_s20  }
  0x1d   : > { %p32_p10 = por %p31_p8, %p30_p6  ;;  %s120_s28 = sand.u32 1, %s1412_s11  }
  0x1e   : > { %s1229_s29 = smul.u32 24, %s120_s28  ;;  %s121_s9 = scalar_lea.sflag [#allocation4], %s120_s28 }
  0x1f   : > { %s1230_s30 = smul.u32 384, %s1416_s12  ;;  %p1519_p11 = pnand %p1248_p9, %p32_p10 }
  0x20   : > { %s124_s7 = scalar_lea.vmem [#allocation3], %s1229_s29  ;;  %s1355_s18 = scalar_lea.hbm %s1706_s0, 768 }
  0x21   : > { %s1526_s6 = scalar_lea.hbm %s1706_s0, %s1230_s30  ;;  %s132_s8 = sshll.u32 %s124_s7, 4  ;;  %s133_s8 = int_to_ptr.vmem [resolvable:$true] %s132_s8 }
  0x22   : > { %s1350_s16 = scalar_lea.hbm %s1526_s6, 384  ;;  %p1352_p12 = pneg %p1519_p11 }
  0x23   : > { %p1351_p7 = scmp.ne.s32.totalorder %s1526_s6, %s1350_s16  ;;  %p1356_p2 = scmp.lt.s32.totalorder %s1526_s6, %s1706_s0 }
  0x24   : > { %p1357_p3 = scmp.lt.s32.totalorder %s1355_s18, %s1350_s16 }
  0x25   : > { %p1353_p13 = pnand %p1352_p12, %p1351_p7 }
  0x26   : > { %p1358_p6 = por %p1357_p3, %p1356_p2 }
  0x27   : > { %p1354_p0 = pneg %p1353_p13 }
  0x29   : > { %p1359_p8 = pnand %p1358_p6, %p1354_p0 }
  0x2b   : > { %1362 = shalt.err (!%p1359_p8)
}
  0x2c   : > { %s1363_s22 = scalar_lea.vmem %s133_s8, 384  ;;  %s1421_s23 = smov [#allocation3]  }
  0x2d   : > { %p1364_p9 = scmp.ne.s32.totalorder %s133_s8, %s1363_s22  ;;  %s1368_s24 = sshll.u32 %s1421_s23, 4  ;;  %s1369_s24 = int_to_ptr.vmem [resolvable:$false] %s1368_s24 }
  0x2e   : > { %s1370_s25 = scalar_lea.vmem %s1369_s24, 768  ;;  %p1371_p7 = scmp.lt.s32.totalorder %s133_s8, %s1369_s24 }
  0x2f   : > { %p1366_p10 = pnand %p1364_p9, %p1352_p12  ;;  %p1372_p13 = scmp.lt.s32.totalorder %s1370_s25, %s1363_s22 }
  0x31   : > { %p1367_p1 = pneg %p1366_p10  ;;  %p1373_p4 = por %p1372_p13, %p1371_p7 }
  0x33   : > { %p1374_p5 = pnand %p1373_p4, %p1367_p1 }
  0x35   : > { %1377 = shalt.err (!%p1374_p5)
}
  0x36   : > { %1246 = dma.hbm_to_vmem [thread:$0]  (!%p1519_p11), %s1526_s6, 384, %s133_s8, %s121_s9  }
  0x37   : > { %p1716_p0 = scmp.ne.s32.totalorder %s1713_s15, 0 }
  0x38   : > { %s143_s26 = sand.u32 (!%p1716_p0), 1, %s1408_s10   ;;  %p1717_p12 = scmp.ne.s32.totalorder (!%p1716_p0), %s1712_s14, 0 }
  0x39   : > { %141 = sbr.rel (%p1716_p0) target bundleno = 485 (0x1e5), region = 28  ;;  %s144_s29 = scalar_lea.sflag (!%p1716_p0), [#allocation4], %s143_s26 }
  0x3a   : > { %s1231_s28 = smul.u32 (!%p1716_p0), 24, %s143_s26 }
  0x3c   : > { %s147_s30 = scalar_lea.vmem (!%p1716_p0), [#allocation3], %s1231_s28 }
  0x3e   : > { %1395 = dma.done.wait (%p1717_p12), %s144_s29, 384  }
  0x3f   : > { %1397 = vsyncadd (%p1717_p12), %s144_s29, 4294966912  ;;  %p1718_p1 = scmp.eq.s32.totalorder %s1473_s13, 0 }
  0x41   : > { %1399 = dma.done.wait (%p1718_p1), [#allocation6], 1024   ;;  %p1719_p4 = pmov %p1718_p1 }
  0x42   : > { %v1422_v0 = vmov 0   ;;  %v178_v3 = vld [vmem:[%s147_s30] sm:$0xff]  ;;  %v179_v4 = vld [vmem:[%s147_s30 + $0x8] sm:$0xff]  ;;  %v180_v5 = vld [vmem:[%s147_s30 + $0x10] sm:$0xff]  ;;  %s1423_s14 = smov 111   ;;  %s1424_s15 = smov 109  }
  0x43   : > { %1401 = vsyncadd (%p1719_p4), [#allocation6], 4294966272  ;;  %v1110_v1 = vcombine.high %v1422_v0, %v1422_v0  ;;  %v1109_v2 = vcombine.low %v1422_v0, %v1422_v0  ;;  %622 = vmatprep.mubr.bf16.mxu0 %v1422_v0  ;;  %v1558_v6 = vpack.c.bf16 %v179_v4, %v178_v3  ;;  %v1146_v7 = vpack.c.bf16 %v180_v5, %v180_v5  ;;  %s1425_s3 = smov 110   ;;  %s1426_s4 = smov 127   ;;  %v1585_v12 = vld [vmem:[#allocation5] sm:$0xff]  }
  0x44   : > { %vm185_vm0 = vcmask 257024   ;;  %s1427_s5 = smov 1   ;;  %s1428_s6 = smov 17   ;;  %v1148_v11 = vpack.c.bf16 %v178_v3, %v178_v3  ;;  %1213 = vmatprep.mubr.bf16.mxu1 %v1585_v12  ;;  %vm321_vm1 = vcmask 117760   ;;  %vm359_vm2 = vcmask 101376  }
  0x45   : > { %590 = vmatprep.subr.bf16.mxu0 %v1110_v1  ;;  %309 = vrot.lane.b32.xlu1 %v1558_v6, %s1423_s14  ;;  %196 = vst.msk [vmem:[#allocation2 + $0xb0] sm:$0xf] %vm185_vm0, %v1422_v0  ;;  %198 = vst.msk [vmem:[#allocation2 + $0xbc] sm:$0xf] %vm185_vm0, %v1422_v0  ;;  %s1429_s7 = smov 97   ;;  %s1430_s8 = smov 113  }
  0x46   : > { %591 = vmatpush1.bf16.msra.mxu0 %v1109_v2  ;;  %347 = vrot.lane.b32.xlu0 %v1558_v6, %s1424_s15  ;;  %186 = vst.msk [vmem:[#allocation2 + $0x74] sm:$0xf] %vm185_vm0, %v1422_v0  ;;  %188 = vst.msk [vmem:[#allocation2 + $0x80] sm:$0xf] %vm185_vm0, %v1422_v0  ;;  %s1431_s9 = smov 18   ;;  %s1432_s16 = smov 19  }
  0x47   : > { %592 = vmatprep.subr.bf16.mxu0 %v1110_v1  ;;  %190 = vst.msk [vmem:[#allocation2 + $0x8c] sm:$0xf] %vm185_vm0, %v1422_v0  ;;  %192 = vst.msk [vmem:[#allocation2 + $0x98] sm:$0xf] %vm185_vm0, %v1422_v0  ;;  %s1433_s12 = smov 114   ;;  %s1434_s17 = smov 115  }
  0x48   : > { %194 = vst.msk [vmem:[#allocation2 + $0xa4] sm:$0xf] %vm185_vm0, %v1422_v0  ;;  %287 = vst.msk [vmem:[#allocation2 + $0x38] sm:$0xf] %vm185_vm0, %v1146_v7  ;;  %s1435_s18 = smov 15   ;;  %s1436_s20 = smov 13  }
  0x49   : > { %311 = vrot.lane.b32.xlu1 %v1146_v7, %s1423_s14  ;;  %s1437_s21 = smov 31   ;;  %s1438_s22 = smov 14   ;;  %vm294_vm3 = vcmask 1043456   ;;  %vm316_vm4 = vcmask 908288   ;;  %vm354_vm5 = vcmask 891904   ;;  %vm340_vm6 = vcmask 109568  }
  0x4a   : > { %593 = vmatpush1.bf16.msra.mxu0 %v1109_v2  ;;  %349 = vrot.lane.b32.xlu0 %v1146_v7, %s1424_s15  ;;  %vm335_vm7 = vcmask 900096   ;;  %vm301_vm8 = vcmask 248832   ;;  %vm296_vm9 = vcmask 1039360   ;;  %vm223_vm10 = vcmask 1047556   ;;  %p172_p5 = scmp.lt.s32.totalorder %s1473_s13, 1 }
  0x4b   : > { %594 = vmatprep.subr.bf16.mxu0 %v1110_v1  ;;  %vm280_vm11 = vcmask 1043464   ;;  %vm261_vm12 = vcmask 1043592   ;;  %vm275_vm13 = vcmask 7168   ;;  %vm256_vm14 = vcmask 138240  }
  0x4c   : > { %v1302_v8 = vld [vmem:[#allocation2 + $0xb0] ss:$12 sps:$4 sm:$0xff]   ;;  %vm268_vm15 = vcmask 3072   ;;  %s1725_s13 = smov (!%p172_p5, %s1473_s13), 1 }
  0x4d   : > { %330 = vrot.lane.b32.xlu1 %v1146_v7, %s1425_s3  ;;  %1197 = vmatprep.subr.bf16.mxu1 %v1302_v8  ;;  %s1232_s23 = smul.u32 192, %s1725_s13 }
  0x4e   : > { %595 = vmatpush1.bf16.msra.mxu0 %v1109_v2  ;;  %328 = vrot.lane.b32.xlu0 %v1558_v6, %s1425_s3  ;;  %v1307_v10 = vld [vmem:[#allocation2 + $0x80] ss:$12 sps:$4 sm:$0xff]  }
  0x4f   : > { %1198 = vmatpush3.bf16.msra.mxu1 %v1302_v8  ;;  %v1306_v9 = vld [vmem:[#allocation2 + $0x98] ss:$12 sps:$4 sm:$0xff]   ;;  %s1643_s26 = scalar_lea.vmem %s1708_s2, %s1232_s23 }
  0x50   : > { %1199 = vmatprep.subr.bf16.mxu1 %v1306_v9 }
  0x51   : > { %290 = vrot.lane.b32.xlu1 %v1146_v7, %s1426_s4 }
  0x52   : > { %288 = vrot.lane.b32.xlu0 %v1558_v6, %s1426_s4 }
  0x53   : > { %1200 = vmatpush3.bf16.msra.mxu1 %v1306_v9 }
  0x54   : > { %1201 = vmatprep.subr.bf16.mxu1 %v1307_v10 }
  0x55   : > { %270 = vrot.lane.b32.xlu1 %v1558_v6, %s1427_s5 }
  0x56   : > { %251 = vrot.lane.b32.xlu0 %v1558_v6, %s1428_s6 }
  0x57   : > { %1202 = vmatpush3.bf16.msra.mxu1 %v1307_v10 }
  0x59   : > { %265 = vrot.lane.b32.xlu1 %v1146_v7, %s1429_s7 }
  0x5a   : > { %246 = vrot.lane.b32.xlu0 %v1146_v7, %s1430_s8 }
  0x5d   : > { %232 = vrot.lane.b32.xlu1 %v1558_v6, %s1431_s9 }
  0x5e   : > { %212 = vrot.lane.b32.xlu0 %v1558_v6, %s1432_s16 }
  0x61   : > { %227 = vrot.lane.b32.xlu1 %v1146_v7, %s1433_s12 }
  0x62   : > { %202 = vrot.lane.b32.xlu0 %v1146_v7, %s1434_s17 }
  0x65   : > { %323 = vrot.lane.b32.xlu1 %v1148_v11, %s1435_s18 }
  0x66   : > { %361 = vrot.lane.b32.xlu0 %v1148_v11, %s1436_s20 }
  0x69   : > { %304 = vrot.lane.b32.xlu1 %v1148_v11, %s1437_s21 }
  0x6a   : > { %342 = vrot.lane.b32.xlu0 %v1148_v11, %s1438_s22 }
  0x6d   : > { %272 = vrot.lane.b32.xlu1 %v1146_v7, %s1427_s5 }
  0x6e   : > { %253 = vrot.lane.b32.xlu0 %v1146_v7, %s1428_s6 }
  0x71   : > { %234 = vrot.lane.b32.xlu1 %v1146_v7, %s1431_s9 }
  0x72   : > { %214 = vrot.lane.b32.xlu0 %v1146_v7, %s1432_s16 }
  0xb7   : > { %v310_v13 = vpop.permute.xlu1 %309 }
  0xb8   : > { %v348_v14 = vpop.permute.xlu0 %347  ;;  %v313_v17 = vrot.slane %v310_v13, 4 }
  0xb9   : > { %v351_v18 = vrot.slane %v348_v14, 4 }
  0xbb   : > { %v312_v15 = vpop.permute.xlu1 %311 }
  0xbc   : > { %v350_v16 = vpop.permute.xlu0 %349  ;;  %v314_v19 = vrot.slane %v312_v15, 4  ;;  %322 = vst.msk [vmem:[#allocation2 + $0x50] sm:$0xf] %vm321_vm1, %v312_v15  ;;  %vm281_vm1 = vmor %vm223_vm10, %vm280_vm11  ;;  %vm205_vm11 = vcmask 150528  }
  0xbd   : > { %v352_v20 = vrot.slane %v350_v16, 4  ;;  %360 = vst.msk [vmem:[#allocation2 + $0x68] sm:$0xf] %vm359_vm2, %v350_v16  ;;  %vm249_vm2 = vcmask 134144   ;;  %v1315_v16 = vld [vmem:[#allocation5 + $0x8] sm:$0xff]  }
  0xbe   : > { %v315_v21 = vsel %vm294_vm3, %v313_v17, %v314_v19  ;;  %v1319_v19 = vld [vmem:[#allocation5 + $0x18] sm:$0xff]  }
  0xbf   : > { %v353_v22 = vsel %vm294_vm3, %v351_v18, %v352_v20  ;;  %v317_v23 = vsel %vm316_vm4, %v310_v13, %v315_v21  ;;  %v331_v25 = vpop.permute.xlu1 %330  ;;  %vm242_vm4 = vcmask 1043600   ;;  %v1318_v18 = vld [vmem:[#allocation5 + $0x10] sm:$0xff]   ;;  %v1320_v20 = vld [vmem:[#allocation5 + $0x20] sm:$0xff]  }
  0xc0   : > { %v355_v24 = vsel %vm354_vm5, %v348_v14, %v353_v22  ;;  %v329_v26 = vpop.permute.xlu0 %328  ;;  %v333_v27 = vrot.slane %v331_v25, 4  ;;  %341 = vst.msk [vmem:[#allocation2 + $0x5c] sm:$0xf] %vm340_vm6, %v331_v25  ;;  %vm222_vm5 = vcmask 1043608   ;;  %vm237_vm6 = vcmask 146432   ;;  %v1322_v21 = vld [vmem:[#allocation5 + $0x30] sm:$0xff]  }
  0xc1   : > { %v332_v28 = vrot.slane %v329_v26, 4  ;;  %v1101_v29 = vcombine.high %v355_v24, %v1422_v0  ;;  %v1100_v30 = vcombine.low %v355_v24, %v1422_v0  ;;  %v1321_v22 = vld [vmem:[#allocation5 + $0x28] sm:$0xff]  }
  0xc3   : > { %v334_v31 = vsel %vm294_vm3, %v332_v28, %v333_v27  ;;  %596 = vmatprep.subr.bf16.mxu0 %v1101_v29  ;;  %v291_v33 = vpop.permute.xlu1 %290 }
  0xc4   : > { %v336_v32 = vsel %vm335_vm7, %v329_v26, %v334_v31  ;;  %v289_v34 = vpop.permute.xlu0 %288  ;;  %597 = vmatpush1.bf16.msra.mxu0 %v1100_v30  ;;  %v293_v35 = vrot.slane %v291_v33, 4  ;;  %302 = vst.msk [vmem:[#allocation2 + $0x44] sm:$0xf] %vm301_vm8, %v291_v33  ;;  %vm217_vm7 = vcmask 154624   ;;  %vm230_vm8 = vcmask 142336  }
  0xc5   : > { %v292_v36 = vrot.slane %v289_v34, 4  ;;  %v1098_v37 = vcombine.high %v317_v23, %v336_v32  ;;  %v1097_v38 = vcombine.low %v317_v23, %v336_v32  ;;  %v1323_v23 = vld [vmem:[#allocation5 + $0x38] sm:$0xff]  }
  0xc7   : > { %v295_v39 = vsel %vm294_vm3, %v292_v36, %v293_v35  ;;  %598 = vmatprep.subr.bf16.mxu0 %v1098_v37  ;;  %v1596_v41 = vpop.permute.xlu1 %270  ;;  %vm262_vm3 = vmor %vm223_vm10, %vm261_vm12 }
  0xc8   : > { %v297_v40 = vsel %vm296_vm9, %v289_v34, %v295_v39  ;;  %v1598_v42 = vpop.permute.xlu0 %251  ;;  %599 = vmatpush1.bf16.msra.mxu0 %v1097_v38  ;;  %v274_v43 = vrot.slane %v1596_v41, 4  ;;  %vm243_vm9 = vmor %vm223_vm10, %vm242_vm4 }
  0xc9   : > { %v255_v44 = vrot.slane %v1598_v42, 4  ;;  %v1095_v45 = vcombine.high %v1558_v6, %v297_v40  ;;  %v1094_v46 = vcombine.low %v1558_v6, %v297_v40  ;;  %vm224_vm12 = vmor %vm223_vm10, %vm222_vm5  ;;  %vm307_vm10 = vcmask 257272  }
  0xca   : > { %v276_v49 = vsel %vm275_vm13, %v274_v43, %v1596_v41 }
  0xcb   : > { %600 = vmatprep.subr.bf16.mxu0 %v1095_v45  ;;  %v266_v47 = vpop.permute.xlu1 %265  ;;  %v257_v50 = vsel %vm256_vm14, %v255_v44, %v1598_v42 }
  0xcc   : > { %v247_v48 = vpop.permute.xlu0 %246  ;;  %601 = vmatpush1.bf16.msra.mxu0 %v1094_v46  ;;  %269 = vst.msk [vmem:[#allocation2 + $0x24] sm:$0xf] %vm268_vm15, %v266_v47  ;;  %vm326_vm15 = vcmask 257144  }
  0xcd   : > { %250 = vst.msk [vmem:[#allocation2 + $0x18] sm:$0xf] %vm249_vm2, %v247_v48  ;;  %vm345_vm2 = vcmask 257136  }
  0xce   : > { %282 = vst.msk [vmem:[#allocation2 + $0x24] sm:$0xff] %vm281_vm1, %v276_v49  ;;  %vm364_vm1 = vcmask 257128  }
  0xcf   : > { %263 = vst.msk [vmem:[#allocation2 + $0x18] sm:$0xff] %vm262_vm3, %v257_v50  ;;  %v233_v51 = vpop.permute.xlu1 %232 }
  0xd0   : > { %v213_v52 = vpop.permute.xlu0 %212  ;;  %v236_v53 = vrot.slane %v233_v51, 4 }
  0xd1   : > { %v216_v54 = vrot.slane %v213_v52, 4 }
  0xd2   : > { %v238_v57 = vsel %vm237_vm6, %v236_v53, %v233_v51 }
  0xd3   : > { %v228_v55 = vpop.permute.xlu1 %227  ;;  %v218_v58 = vsel %vm217_vm7, %v216_v54, %v213_v52 }
  0xd4   : > { %v203_v56 = vpop.permute.xlu0 %202  ;;  %231 = vst.msk [vmem:[#allocation2 + $0xc] sm:$0xf] %vm230_vm8, %v228_v55 }
  0xd5   : > { %206 = vst.msk [vmem:[#allocation2] sm:$0xf] %vm205_vm11, %v203_v56 }
  0xd6   : > { %v1303_v59 = vld [vmem:[#allocation2 + $0x1c] ss:$12 sps:$4 sm:$0xff]   ;;  %244 = vst.msk [vmem:[#allocation2 + $0xc] sm:$0xff] %vm243_vm9, %v238_v57  ;;  %v1305_v60 = vld [vmem:[#allocation2 + $0x18] ss:$12 sps:$4 sm:$0xff]  }
  0xd7   : > { %225 = vst.msk [vmem:[#allocation2] sm:$0xff] %vm224_vm12, %v218_v58  ;;  %602 = vmatprep.subr.bf16.mxu0 %v1303_v59  ;;  %v324_v61 = vpop.permute.xlu1 %323 }
  0xd8   : > { %v362_v62 = vpop.permute.xlu0 %361  ;;  %603 = vmatpush1.bf16.msra.mxu0 %v1305_v60  ;;  %327 = vst.msk [vmem:[#allocation2 + $0x50] sm:$0xf] %vm326_vm15, %v324_v61 }
  0xd9   : > { %365 = vst.msk [vmem:[#allocation2 + $0x68] sm:$0xf] %vm364_vm1, %v362_v62 }
  0xdb   : > { %v305_v63 = vpop.permute.xlu1 %304 }
  0xdc   : > { %v343_v1 = vpop.permute.xlu0 %342  ;;  %308 = vst.msk [vmem:[#allocation2 + $0x44] sm:$0xf] %vm307_vm10, %v305_v63 }
  0xdd   : > { %346 = vst.msk [vmem:[#allocation2 + $0x5c] sm:$0xf] %vm345_vm2, %v343_v1 }
  0xde   : > { %v1308_v2 = vld [vmem:[#allocation2 + $0x4] ss:$12 sps:$4 sm:$0xff]   ;;  %v1310_v3 = vld [vmem:[#allocation2] ss:$12 sps:$4 sm:$0xff]  }
  0xdf   : > { %604 = vmatprep.subr.bf16.mxu0 %v1308_v2  ;;  %v273_v4 = vpop.permute.xlu1 %272 }
  0xe0   : > { %v254_v5 = vpop.permute.xlu0 %253  ;;  %605 = vmatpush1.bf16.msra.mxu0 %v1310_v3  ;;  %v1311_v6 = vld [vmem:[#allocation2 + $0x68] ss:$12 sps:$4 sm:$0xff]   ;;  %v277_v7 = vsel %vm275_vm13, %v274_v43, %v273_v4 }
  0xe1   : > { %v258_v8 = vsel %vm256_vm14, %v255_v44, %v254_v5  ;;  %283 = vst.msk [vmem:[#allocation2 + $0x2c] sm:$0xf] %vm185_vm0, %v277_v7  ;;  %1203 = vmatprep.subr.bf16.mxu1 %v1311_v6 }
  0xe2   : > { %264 = vst.msk [vmem:[#allocation2 + $0x20] sm:$0xf] %vm185_vm0, %v258_v8  ;;  %1204 = vmatpush3.bf16.msra.mxu1 %v1311_v6 }
  0xe3   : > { %623 = vmatmul.mubr.bf16.vlgmr.msra.gmra.mxu0 %v1585_v12  ;;  %v235_v9 = vpop.permute.xlu1 %234  ;;  %v1314_v15 = vld [vmem:[#allocation2 + $0x38] ss:$12 sps:$4 sm:$0xff]  }
  0xe4   : > { %v215_v10 = vpop.permute.xlu0 %214  ;;  %v1313_v11 = vld [vmem:[#allocation2 + $0x50] ss:$12 sps:$4 sm:$0xff]   ;;  %632 = vmatprep.mubr.bf16.mxu0 %v1422_v0  ;;  %v239_v13 = vsel %vm237_vm6, %v236_v53, %v235_v9 }
  0xe5   : > { %v219_v14 = vsel %vm217_vm7, %v216_v54, %v215_v10  ;;  %245 = vst.msk [vmem:[#allocation2 + $0x14] sm:$0xf] %vm185_vm0, %v239_v13  ;;  %1205 = vmatprep.subr.bf16.mxu1 %v1313_v11 }
  0xe6   : > { %226 = vst.msk [vmem:[#allocation2 + $0x8] sm:$0xf] %vm185_vm0, %v219_v14  ;;  %1206 = vmatpush3.bf16.msra.mxu1 %v1313_v11 }
  0xe7   : > { %1207 = vmatprep.subr.bf16.mxu1 %v1314_v15 }
  0xe9   : > { %v1316_v17 = vld [vmem:[#allocation2 + $0x20] ss:$12 sps:$4 sm:$0xff]  }
  0xea   : > { %1208 = vmatpush3.bf16.msra.mxu1 %v1314_v15 }
  0xeb   : > { %633 = vmatmul.mubr.bf16.gmra.mxu0 %v1315_v16  ;;  %1209 = vmatprep.subr.bf16.mxu1 %v1316_v17 }
  0xec   : > { %642 = vmatprep.mubr.bf16.mxu0 %v1422_v0 }
  0xed   : > { %v1317_v12 = vld [vmem:[#allocation2 + $0x8] ss:$12 sps:$4 sm:$0xff]  }
  0xee   : > { %1210 = vmatpush3.bf16.msra.mxu1 %v1316_v17 }
  0xef   : > { %1211 = vmatprep.subr.bf16.mxu1 %v1317_v12 }
  0xf2   : > { %1212 = vmatpush3.bf16.msra.mxu1 %v1317_v12 }
  0xf3   : > { %643 = vmatmul.mubr.bf16.gmra.mxu0 %v1318_v18 }
  0xf4   : > { %652 = vmatprep.mubr.bf16.mxu0 %v1422_v0 }
  0xf5   : > { %1214 = vmatmul.mubr.bf16.vlgmr.msra.gmra.mxu1 %v1315_v16 }
  0xf6   : > { %1217 = vmatprep.mubr.bf16.mxu1 %v1318_v18 }
  0xfb   : > { %653 = vmatmul.mubr.bf16.gmra.mxu0 %v1319_v19 }
  0xfc   : > { %662 = vmatprep.mubr.bf16.mxu0 %v1422_v0 }
  0xfd   : > { %1218 = vmatmul.mubr.bf16.gmra.mxu1 %v1319_v19 }
  0xfe   : > { %1221 = vmatprep.mubr.bf16.mxu1 %v1320_v20 }
 0x103   : > { %663 = vmatmul.mubr.bf16.gmra.mxu0 %v1320_v20 }
 0x104   : > { %672 = vmatprep.mubr.bf16.mxu0 %v1422_v0 }
 0x105   : > { %1222 = vmatmul.mubr.bf16.gmra.mxu1 %v1321_v22 }
 0x106   : > { %1225 = vmatprep.mubr.bf16.mxu1 %v1322_v21 }
 0x10b   : > { %673 = vmatmul.mubr.bf16.gmra.mxu0 %v1321_v22 }
 0x10c   : > { %682 = vmatprep.mubr.bf16.mxu0 %v1422_v0 }
 0x10d   : > { %1226 = vmatmul.mubr.bf16.gmra.mxu1 %v1323_v23 }
 0x113   : > { %683 = vmatmul.mubr.bf16.gmra.mxu0 %v1322_v21 }
 0x114   : > { %692 = vmatprep.mubr.bf16.mxu0 %v1422_v0 }
 0x11b   : > { %693 = vmatmul.mubr.bf16.gmra.mxu0 %v1323_v23 }
 0x1a3   : > { %v624_v24 = vpop.f32.mrf.mxu0 }
 0x1a5   : > { %v626_v25 = vpop.f32.mrf.mxu0 }
 0x1a6   : > { %v1149_v26 = vpack.c.bf16 %v626_v25, %v624_v24 }
 0x1a7   : > { %v628_v27 = vpop.f32.mrf.mxu0 }
 0x1a8   : > { %960 = vst [vmem:[%s1643_s26] sm:$0xff] %v1149_v26 }
 0x1a9   : > { %v630_v28 = vpop.f32.mrf.mxu0 }
 0x1aa   : > { %v1151_v0 = vpack.c.bf16 %v630_v28, %v628_v27 }
 0x1ab   : > { %v634_v29 = vpop.f32.mrf.mxu0 }
 0x1ac   : > { %962 = vst [vmem:[%s1643_s26 + $0xc] sm:$0xff] %v1151_v0 }
 0x1ad   : > { %v636_v30 = vpop.f32.mrf.mxu0 }
 0x1ae   : > { %v1153_v31 = vpack.c.bf16 %v636_v30, %v634_v29 }
 0x1af   : > { %v638_v32 = vpop.f32.mrf.mxu0 }
 0x1b0   : > { %964 = vst [vmem:[%s1643_s26 + $0x18] sm:$0xff] %v1153_v31 }
 0x1b1   : > { %v640_v33 = vpop.f32.mrf.mxu0 }
 0x1b2   : > { %v1155_v34 = vpack.c.bf16 %v640_v33, %v638_v32 }
 0x1b3   : > { %v644_v35 = vpop.f32.mrf.mxu0 }
 0x1b4   : > { %966 = vst [vmem:[%s1643_s26 + $0x24] sm:$0xff] %v1155_v34 }
 0x1b5   : > { %v646_v36 = vpop.f32.mrf.mxu0  ;;  %v1215_v38 = vpop.f32.mrf.mxu1 }
 0x1b6   : > { %v1157_v37 = vpack.c.bf16 %v646_v36, %v644_v35  ;;  %v1154_v40 = vpack.c.bf16 %v1215_v38, %v1215_v38 }
 0x1b7   : > { %v648_v39 = vpop.f32.mrf.mxu0  ;;  %v737_v41 = vpop.f32.mrf.mxu1 }
 0x1b8   : > { %968 = vst [vmem:[%s1643_s26 + $0x30] sm:$0xff] %v1157_v37  ;;  %965 = vst.msk [vmem:[%s1643_s26 + $0x20] sm:$0xf] %vm185_vm0, %v1154_v40  ;;  %v1150_v43 = vpack.c.bf16 %v737_v41, %v737_v41 }
 0x1b9   : > { %v650_v42 = vpop.f32.mrf.mxu0  ;;  %v1216_v45 = vpop.f32.mrf.mxu1 }
 0x1ba   : > { %v1159_v44 = vpack.c.bf16 %v650_v42, %v648_v39  ;;  %961 = vst.msk [vmem:[%s1643_s26 + $0x8] sm:$0xf] %vm185_vm0, %v1150_v43  ;;  %v1156_v47 = vpack.c.bf16 %v1216_v45, %v1216_v45 }
 0x1bb   : > { %v654_v46 = vpop.f32.mrf.mxu0  ;;  %v740_v48 = vpop.f32.mrf.mxu1 }
 0x1bc   : > { %970 = vst [vmem:[%s1643_s26 + $0x3c] sm:$0xff] %v1159_v44  ;;  %967 = vst.msk [vmem:[%s1643_s26 + $0x2c] sm:$0xf] %vm185_vm0, %v1156_v47  ;;  %v1152_v50 = vpack.c.bf16 %v740_v48, %v740_v48 }
 0x1bd   : > { %v656_v49 = vpop.f32.mrf.mxu0  ;;  %v1219_v52 = vpop.f32.mrf.mxu1 }
 0x1be   : > { %v1161_v51 = vpack.c.bf16 %v656_v49, %v654_v46  ;;  %963 = vst.msk [vmem:[%s1643_s26 + $0x14] sm:$0xf] %vm185_vm0, %v1152_v50  ;;  %v1162_v54 = vpack.c.bf16 %v1219_v52, %v1219_v52 }
 0x1bf   : > { %v658_v53 = vpop.f32.mrf.mxu0  ;;  %v753_v55 = vpop.f32.mrf.mxu1 }
 0x1c0   : > { %972 = vst [vmem:[%s1643_s26 + $0x48] sm:$0xff] %v1161_v51  ;;  %973 = vst.msk [vmem:[%s1643_s26 + $0x50] sm:$0xf] %vm185_vm0, %v1162_v54  ;;  %v1158_v57 = vpack.c.bf16 %v753_v55, %v753_v55 }
 0x1c1   : > { %v660_v56 = vpop.f32.mrf.mxu0  ;;  %v1220_v59 = vpop.f32.mrf.mxu1 }
 0x1c2   : > { %v1163_v58 = vpack.c.bf16 %v660_v56, %v658_v53  ;;  %969 = vst.msk [vmem:[%s1643_s26 + $0x38] sm:$0xf] %vm185_vm0, %v1158_v57  ;;  %v1164_v61 = vpack.c.bf16 %v1220_v59, %v1220_v59 }
 0x1c3   : > { %v664_v60 = vpop.f32.mrf.mxu0  ;;  %v756_v62 = vpop.f32.mrf.mxu1 }
 0x1c4   : > { %974 = vst [vmem:[%s1643_s26 + $0x54] sm:$0xff] %v1163_v58  ;;  %975 = vst.msk [vmem:[%s1643_s26 + $0x5c] sm:$0xf] %vm185_vm0, %v1164_v61  ;;  %v1160_v1 = vpack.c.bf16 %v756_v62, %v756_v62 }
 0x1c5   : > { %v666_v63 = vpop.f32.mrf.mxu0  ;;  %v1223_v3 = vpop.f32.mrf.mxu1 }
 0x1c6   : > { %v1165_v2 = vpack.c.bf16 %v666_v63, %v664_v60  ;;  %971 = vst.msk [vmem:[%s1643_s26 + $0x44] sm:$0xf] %vm185_vm0, %v1160_v1  ;;  %v1170_v5 = vpack.c.bf16 %v1223_v3, %v1223_v3 }
 0x1c7   : > { %v668_v4 = vpop.f32.mrf.mxu0  ;;  %v769_v6 = vpop.f32.mrf.mxu1 }
 0x1c8   : > { %976 = vst [vmem:[%s1643_s26 + $0x60] sm:$0xff] %v1165_v2  ;;  %981 = vst.msk [vmem:[%s1643_s26 + $0x80] sm:$0xf] %vm185_vm0, %v1170_v5  ;;  %v1166_v8 = vpack.c.bf16 %v769_v6, %v769_v6 }
 0x1c9   : > { %v670_v7 = vpop.f32.mrf.mxu0  ;;  %v1224_v10 = vpop.f32.mrf.mxu1 }
 0x1ca   : > { %v1167_v9 = vpack.c.bf16 %v670_v7, %v668_v4  ;;  %977 = vst.msk [vmem:[%s1643_s26 + $0x68] sm:$0xf] %vm185_vm0, %v1166_v8  ;;  %v1172_v13 = vpack.c.bf16 %v1224_v10, %v1224_v10 }
 0x1cb   : > { %v674_v11 = vpop.f32.mrf.mxu0  ;;  %v772_v14 = vpop.f32.mrf.mxu1 }
 0x1cc   : > { %978 = vst [vmem:[%s1643_s26 + $0x6c] sm:$0xff] %v1167_v9  ;;  %983 = vst.msk [vmem:[%s1643_s26 + $0x8c] sm:$0xf] %vm185_vm0, %v1172_v13  ;;  %v1168_v16 = vpack.c.bf16 %v772_v14, %v772_v14 }
 0x1cd   : > { %v676_v15 = vpop.f32.mrf.mxu0  ;;  %v1227_v12 = vpop.f32.mrf.mxu1 }
 0x1ce   : > { %v1169_v17 = vpack.c.bf16 %v676_v15, %v674_v11  ;;  %979 = vst.msk [vmem:[%s1643_s26 + $0x74] sm:$0xf] %vm185_vm0, %v1168_v16  ;;  %v1178_v19 = vpack.c.bf16 %v1227_v12, %v1227_v12 }
 0x1cf   : > { %v678_v18 = vpop.f32.mrf.mxu0  ;;  %v785_v20 = vpop.f32.mrf.mxu1 }
 0x1d0   : > { %980 = vst [vmem:[%s1643_s26 + $0x78] sm:$0xff] %v1169_v17  ;;  %989 = vst.msk [vmem:[%s1643_s26 + $0xb0] sm:$0xf] %vm185_vm0, %v1178_v19  ;;  %v1174_v22 = vpack.c.bf16 %v785_v20, %v785_v20 }
 0x1d1   : > { %v680_v21 = vpop.f32.mrf.mxu0  ;;  %v1228_v24 = vpop.f32.mrf.mxu1 }
 0x1d2   : > { %v1171_v23 = vpack.c.bf16 %v680_v21, %v678_v18  ;;  %985 = vst.msk [vmem:[%s1643_s26 + $0x98] sm:$0xf] %vm185_vm0, %v1174_v22  ;;  %v1180_v26 = vpack.c.bf16 %v1228_v24, %v1228_v24 }
 0x1d3   : > { %v684_v25 = vpop.f32.mrf.mxu0  ;;  %v788_v27 = vpop.f32.mrf.mxu1 }
 0x1d4   : > { %982 = vst [vmem:[%s1643_s26 + $0x84] sm:$0xff] %v1171_v23  ;;  %991 = vst.msk [vmem:[%s1643_s26 + $0xbc] sm:$0xf] %vm185_vm0, %v1180_v26  ;;  %v1176_v0 = vpack.c.bf16 %v788_v27, %v788_v27 }
 0x1d5   : > { %v686_v28 = vpop.f32.mrf.mxu0 }
 0x1d6   : > { %v1173_v29 = vpack.c.bf16 %v686_v28, %v684_v25  ;;  %987 = vst.msk [vmem:[%s1643_s26 + $0xa4] sm:$0xf] %vm185_vm0, %v1176_v0 }
 0x1d7   : > { %v688_v30 = vpop.f32.mrf.mxu0 }
 0x1d8   : > { %984 = vst [vmem:[%s1643_s26 + $0x90] sm:$0xff] %v1173_v29 }
 0x1d9   : > { %v690_v31 = vpop.f32.mrf.mxu0 }
 0x1da   : > { %v1175_v32 = vpack.c.bf16 %v690_v31, %v688_v30 }
 0x1db   : > { %v694_v33 = vpop.f32.mrf.mxu0 }
 0x1dc   : > { %986 = vst [vmem:[%s1643_s26 + $0x9c] sm:$0xff] %v1175_v32 }
 0x1dd   : > { %v696_v34 = vpop.f32.mrf.mxu0 }
 0x1de   : > { %v1177_v35 = vpack.c.bf16 %v696_v34, %v694_v33 }
 0x1df   : > { %v698_v36 = vpop.f32.mrf.mxu0 }
 0x1e0   : > { %988 = vst [vmem:[%s1643_s26 + $0xa8] sm:$0xff] %v1177_v35 }
 0x1e1   : > { %v700_v37 = vpop.f32.mrf.mxu0 }
 0x1e2   : > { %v1179_v38 = vpack.c.bf16 %v700_v37, %v698_v36 }
 0x1e4   : > { %990 = vst [vmem:[%s1643_s26 + $0xb4] sm:$0xff] %v1179_v38 }
 0x1e5 PF: > { %p13_p11 = scmp.ge.s32.totalorder %s1498_s19, 4   ;;  %s1720_s9 = smov %s1408_s10 }
 0x1e6   : > { %s1721_s10 = smov %s1412_s11  ;;  %s1722_s11 = smov %s1515_s27 }
 0x1e7   : > { %s1723_s12 = smov %s1498_s19  ;;  %15 = sbr.rel (!%p13_p11) target bundleno = 4 (0x4), region = 72 }
 0x1ec   :  { %1013 = vsyncpa [#allocation4], 1 }
 0x1ed   :  { %1015 = vsyncpa [#allocation4 + $0x1], 1 }
 0x1ee   :  { %1016 = vsyncpa [#allocation6], 1 }

</bundles_post_ra>
